<compile_context>
chip_gen: v5e
topology: v5e:2x2
jax: 0.10.0
libtpu: 0.0.40
codegen_flags: <defaults>
</compile_context>

<pallas_src>
import functools

import numpy as np
import jax
import jax.numpy as jnp
from jax.experimental import pallas as pl
from jax.experimental.pallas import tpu as pltpu

_VMEM = pl.BlockSpec(memory_space=pltpu.MemorySpace.VMEM)
_BN_EPS = 1e-5


# ----------------------------------------------------------------------------
# One-off probe: determine pltpu.roll's rotation direction (robust to either
# sign convention).  Runs a tiny (8,128) kernel once; result is cached.
# ----------------------------------------------------------------------------
@functools.lru_cache(maxsize=None)
def _pltpu_roll_matches_jnp() -> bool:
    def probe(x_ref, o_ref):
        o_ref[...] = pltpu.roll(x_ref[...], 1, axis=1)

    x = jnp.broadcast_to(jnp.arange(128, dtype=jnp.float32), (8, 128))
    y = pl.pallas_call(
        probe,
        out_shape=jax.ShapeDtypeStruct((8, 128), jnp.float32),
        in_specs=[_VMEM],
        out_specs=_VMEM,
    )(x)
    # jnp.roll(x, 1, axis=1)[0, 1] == x[0, 0] == 0.0
    return bool(y[0, 1] == 0.0)


# ----------------------------------------------------------------------------
# Single fused kernel: whole MyNet forward, channels-major (C, M) layout,
# everything resident in VMEM / vregs.
# ----------------------------------------------------------------------------
def _mynet_fused_kernel(patches_ref, w_stem_ref, b_stem_ref,
                        dw_w_ref, dw_b_ref, pw_w_ref, pw_b_ref,
                        w_last_ref, b_last_ref, w_fc_ref, b_fc_ref,
                        o_ref, *, n_img, height, width, roll_is_jnp):
    """patches_ref: (32, M)     bf16 stem im2col patches (27 rows + 5 zero rows)
       w_stem_ref : (C, 32)     bf16 stem weight (BN scale folded, zero cols 27..31)
       b_stem_ref : (C, 1)      f32 folded BN bias
       dw_w_ref   : (3, C, 9)   f32 depthwise weights per block (BN scale folded)
       dw_b_ref   : (3, C, 1)   f32
       pw_w_ref   : (3, C, C)   bf16 pointwise projection (cout, cin), BN folded
       pw_b_ref   : (3, C, 1)   f32
       w_last_ref : (C_last, C) bf16 last 1x1 conv (BN scale folded)
       b_last_ref : (C_last, 1) f32
       w_fc_ref   : (C_last, classes) bf16, 1/(H*W) avg-pool scale folded in
       b_fc_ref   : (1, classes) f32
       o_ref      : (N, classes) f32
    """
    M = patches_ref.shape[1]
    hw = height * width
    n_blocks = dw_w_ref.shape[0]

    offsets = [(dy, dx) for dy in (-1, 0, 1) for dx in (-1, 0, 1)]

    # ---- border masks (1, M), built once and reused by every block ----------
    m_idx = jax.lax.broadcasted_iota(jnp.int32, (1, M), 1)
    h_idx = (m_idx // width) % height
    w_idx = m_idx % width
    masks = {}
    for dy, dx in offsets:
        if dy == 0 and dx == 0:
            continue
        ok = ((h_idx + dy >= 0) & (h_idx + dy < height) &
              (w_idx + dx >= 0) & (w_idx + dx < width))
        masks[(dy, dx)] = ok.astype(jnp.float32)

    def tap(act, dy, dx):
        # tap[c, m] = act[c, m + dy*W + dx]   (zero outside the image)
        off = dy * width + dx
        shift = (-off) % M if roll_is_jnp else off % M
        return pltpu.roll(act, shift, axis=1) * masks[(dy, dx)]

    # ---- stem: single aligned im2col MXU dot + folded BN bias + ReLU6 -------
    act = jnp.dot(w_stem_ref[...], patches_ref[...],
                  preferred_element_type=jnp.float32)
    act = jnp.clip(act + b_stem_ref[...], 0.0, 6.0)               # (C, M) f32

    # ---- 3 InvertedResidual blocks (expand_ratio=1, stride=1, shortcut) -----
    for blk in range(n_blocks):
        dwb = dw_w_ref[blk]                                        # (C, 9)
        acc = act * dwb[:, 4:5]                                    # centre tap seeds
        for t, (dy, dx) in enumerate(offsets):
            if dy == 0 and dx == 0:
                continue
            acc = acc + tap(act, dy, dx) * dwb[:, t:t + 1]
        hdw = jnp.clip(acc + dw_b_ref[blk], 0.0, 6.0)              # (C, M)
        # 1x1 projection on the MXU (bf16 in, f32 acc) + folded BN + shortcut
        y = jnp.dot(pw_w_ref[blk], hdw.astype(jnp.bfloat16),
                    preferred_element_type=jnp.float32)            # (C, M)
        act = act + y + pw_b_ref[blk]

    # ---- last ConvBNReLU6 1x1 (C -> C_last) ----------------------------------
    z = jnp.dot(w_last_ref[...], act.astype(jnp.bfloat16),
                preferred_element_type=jnp.float32)                # (C_last, M)
    z = jnp.clip(z + b_last_ref[...], 0.0, 6.0)

    # ---- global average pool (scale folded into fc_w) + Dropout(eval) + Linear
    pooled = jnp.stack(
        [jnp.sum(z[:, n * hw:(n + 1) * hw], axis=1) for n in range(n_img)],
        axis=0)                                                    # (N, C_last)
    o_ref[...] = (jnp.dot(pooled.astype(jnp.bfloat16), w_fc_ref[...],
                          preferred_element_type=jnp.float32)
                  + b_fc_ref[...])


# ----------------------------------------------------------------------------
# Wrapper: wrapper-side im2col for the stem + one pallas_call for the forward.
# ----------------------------------------------------------------------------
def mynet_forward(params, x_nchw):
    n, cin, h, w = x_nchw.shape
    x = x_nchw.astype(jnp.float32)

    # Stem im2col (tiny: M x 27 x 4B = 55 KB), row order = tap-major, channel-minor.
    xp = jnp.pad(x, ((0, 0), (0, 0), (1, 1), (1, 1)))
    taps = [xp[:, :, 1 + dy:1 + dy + h, 1 + dx:1 + dx + w]
            for dy in (-1, 0, 1) for dx in (-1, 0, 1)]             # 9 x (N,Cin,H,W)
    pat = jnp.stack(taps, axis=0).transpose(0, 2, 1, 3, 4)         # (9,Cin,N,H,W)
    pat = pat.reshape(9 * cin, n * h * w)                          # (27, M)
    k_pad = params["stem_w"].shape[1]                              # 32
    pat = jnp.pad(pat, ((0, k_pad - 9 * cin), (0, 0))).astype(jnp.bfloat16)

    num_classes = params["fc_w"].shape[1]
    kernel = functools.partial(
        _mynet_fused_kernel, n_img=n, height=h, width=w,
        roll_is_jnp=_pltpu_roll_matches_jnp())

    return pl.pallas_call(
        kernel,
        out_shape=jax.ShapeDtypeStruct((n, num_classes), jnp.float32),
        in_specs=[_VMEM] * 11,
        out_specs=_VMEM,
    )(pat, params["stem_w"], params["stem_b"],
      params["dw_w"], params["dw_b"], params["pw_w"], params["pw_b"],
      params["last_w"], params["last_b"], params["fc_w"], params["fc_b"])


# ----------------------------------------------------------------------------
# Deterministic parameter init (mirrors MyNet.__init__), BN scale folded into
# the conv weights (eval-mode running stats), matmul weights stored in bf16.
# ----------------------------------------------------------------------------
def _fold_bn(c):
    # fresh nn.BatchNorm2d: gamma=1, beta=0, running_mean=0, running_var=1
    gamma = jnp.ones((c,), jnp.float32)
    beta = jnp.zeros((c,), jnp.float32)
    mean = jnp.zeros((c,), jnp.float32)
    var = jnp.ones((c,), jnp.float32)
    scale = gamma * jax.lax.rsqrt(var + _BN_EPS)
    bias = beta - mean * scale
    return scale, bias


def init_params(key, num_classes=30, pool_hw=256):
    C, LAST, CIN = 32, 128, 3
    keys = jax.random.split(key, 9)
    p = {}

    # stem Conv2d(3,32,3,p=1,bias=False); kaiming fan_out: std = sqrt(2/(32*9))
    s, b = _fold_bn(C)
    std = np.sqrt(2.0 / (C * 9))
    w = jax.random.normal(keys[0], (3, 3, CIN, C), jnp.float32) * std   # (ky,kx,ci,co)
    w = w.reshape(9 * CIN, C) * s[None, :]                              # (27, C)
    w = jnp.pad(w, ((0, C - 9 * CIN), (0, 0)))                          # (32, C)
    p["stem_w"] = w.T.astype(jnp.bfloat16)                              # (C, 32)
    p["stem_b"] = b.reshape(C, 1)

    # 3 inverted-residual blocks (expand_ratio=1, stride=1, 32->32)
    dw_w, dw_b, pw_w, pw_b = [], [], [], []
    for i in range(3):
        s1, b1 = _fold_bn(C)
        std_dw = np.sqrt(2.0 / 9.0)   # grouped conv fan_out = out*k*k/groups = 9
        wdw = jax.random.normal(keys[1 + 2 * i], (3, 3, C), jnp.float32) * std_dw
        dw_w.append((wdw.reshape(9, C) * s1[None, :]).T)                # (C, 9)
        dw_b.append(b1.reshape(C, 1))
        s2, b2 = _fold_bn(C)
        std_pw = np.sqrt(2.0 / C)     # Conv2d(32,32,1) fan_out = 32
        wpw = jax.random.normal(keys[2 + 2 * i], (C, C), jnp.float32) * std_pw  # (cout,cin)
        pw_w.append(wpw * s2[:, None])
        pw_b.append(b2.reshape(C, 1))
    p["dw_w"] = jnp.stack(dw_w, axis=0)                        # (3, C, 9)  f32
    p["dw_b"] = jnp.stack(dw_b, axis=0)                        # (3, C, 1)  f32
    p["pw_w"] = jnp.stack(pw_w, axis=0).astype(jnp.bfloat16)   # (3, C, C)  bf16
    p["pw_b"] = jnp.stack(pw_b, axis=0)                        # (3, C, 1)  f32

    # last ConvBNReLU6(32, 128, kernel_size=1): fan_out = 128
    s3, b3 = _fold_bn(LAST)
    std_last = np.sqrt(2.0 / LAST)
    wl = jax.random.normal(keys[7], (LAST, C), jnp.float32) * std_last  # (cout,cin)
    p["last_w"] = (wl * s3[:, None]).astype(jnp.bfloat16)               # (LAST, C)
    p["last_b"] = b3.reshape(LAST, 1)

    # classifier: Linear(128, 30), normal(0, sqrt(2/(30+128))), zero bias.
    # 1/(H*W) average-pool scale folded into the weight.
    std_fc = np.sqrt(2.0 / (num_classes + LAST))
    wfc = jax.random.normal(keys[8], (LAST, num_classes), jnp.float32) * std_fc
    p["fc_w"] = (wfc * (1.0 / pool_hw)).astype(jnp.bfloat16)            # (LAST, classes)
    p["fc_b"] = jnp.zeros((1, num_classes), jnp.float32)
    return p


if __name__ == "__main__":
    key = jax.random.PRNGKey(0)
    k_in, k_par = jax.random.split(key)
    # small CIFAR-like input: batch=2, 3 channels, 16x16 spatial (NCHW like PyTorch)
    x = jax.random.normal(k_in, (2, 3, 16, 16), jnp.float32)
    params = init_params(k_par, num_classes=30, pool_hw=16 * 16)

    _pltpu_roll_matches_jnp()   # run the roll-direction probe once, before tracing

    out = jax.jit(mynet_forward)(params, x)
    out = jax.block_until_ready(out)
    assert out.shape == (2, 30) and out.dtype == jnp.float32
    assert bool(jnp.all(jnp.isfinite(out)))
    print("KERNEL_OK")
</pallas_src>

<mosaic_0001>
module attributes {stable_mosaic.version = 11 : i64} {
  func.func @probe(%arg0: memref<8x128xf32, #tpu.memory_space<vmem>>, %arg1: memref<8x128xf32, #tpu.memory_space<vmem>>) attributes {dimension_semantics = [], scalar_prefetch = 0 : i64, scratch_operands = 0 : i64, tpu.core_type = #tpu.core_type<tc>} {
    %c0 = arith.constant 0 : index
    %c0_0 = arith.constant 0 : index
    %0 = vector.load %arg0[%c0, %c0_0] : memref<8x128xf32, #tpu.memory_space<vmem>>, vector<8x128xf32>
    %c1_i32 = arith.constant 1 : i32
    %1 = tpu.dynamic_rotate %0 by %c1_i32 dim 1 : vector<8x128xf32>, i32 -> vector<8x128xf32>
    %c0_1 = arith.constant 0 : index
    %c0_2 = arith.constant 0 : index
    %2 = vector.load %arg1[%c0_1, %c0_2] : memref<8x128xf32, #tpu.memory_space<vmem>>, vector<8x128xf32>
    tpu.vector_store %arg1[%c0_1, %c0_2], %1 {strides = array<i32>} : memref<8x128xf32, #tpu.memory_space<vmem>>, vector<8x128xf32>,
    return
  }
}

</mosaic_0001>

<bundles_post_ra>
// kernel: tpu_custom_call.1
= control target key start
LH: loop header
LB: loop body
LE: loop exit
PB: predicated region body
PF: predicated region fallthrough
CT: control target
= control target key end

     0   :  { %6 = vsyncpa [#allocation3], 0  ;;  %s118_s0 = inlined_call_operand.hbm [shape: f32[8,128], index: 0, kind: input, shape index: {}]   ;;  %s119_s1 = inlined_call_operand.hbm [shape: f32[8,128], index: 1, kind: output, shape index: {}]  }
   0x1   :  { %7 = vsyncpa [#allocation4], 0  ;;  %s13_s8 = sshll.u32 %s118_s0, 4  ;;  %s99_s9 = smov [#allocation2]   ;;  %s14_s8 = int_to_ptr.hbm [resolvable:$true] %s13_s8 }
   0x2   :  { %s15_s10 = sshll.u32 %s99_s9, 4  ;;  %s16_s10 = int_to_ptr.vmem [resolvable:$true] %s15_s10 }
   0x3   :  { %18 = dma.hbm_to_vmem [thread:$0]  %s14_s8, 128, %s16_s10, [#allocation3]  }
   0x4   :  { %95 = dma.done.wait [#allocation3], 128  }
   0x5   :  { %96 = vsyncadd [#allocation3], 4294967168  ;;  %v23_v0 = vld [vmem:[#allocation2] sm:$0xff]  ;;  %s100_s11 = smov 1   ;;  %s101_s12 = smov [#allocation5]  }
   0x6   :  { %24 = vrot.lane.b32.xlu0 %v23_v0, %s100_s11  ;;  %s32_s13 = sshll.u32 %s101_s12, 4  ;;  %s34_s16 = sshll.u32 %s119_s1, 4  ;;  %s33_s13 = int_to_ptr.vmem [resolvable:$true] %s32_s13  ;;  %s35_s16 = int_to_ptr.hbm [resolvable:$true] %s34_s16 }
  0x78   :  { %v25_v1 = vpop.permute.xlu0 %24 }
  0x79   :  { %26 = vst [vmem:[#allocation5] sm:$0xff] %v25_v1 }
  0x7a   :  { %37 = dma.vmem_to_hbm [thread:$0]  %s33_s13, 128, %s35_s16, [#allocation4]  }
  0x7b   :  { %97 = dma.done.wait [#allocation4], 128  }
  0x7c   :  { %98 = vsyncadd [#allocation4], 4294967168 }
  0x7d   :  { %42 = vsyncpa [#allocation3], 1 }
  0x7e   :  { %43 = vsyncpa [#allocation4], 1 }

</bundles_post_ra>
